<compile_context>
chip_gen: v6e
topology: v6e:2x2x1
jax: 0.10.0
libtpu: 0.0.40
codegen_flags: <defaults>
</compile_context>

<pallas_src>
import jax
import jax.numpy as jnp
import numpy as np
from jax.experimental import pallas as pl
from jax.experimental.pallas import tpu as pltpu


def transition_kernel(x_ref, scale_ref, shift_ref, w_ref, o_ref):
    # x_ref:     (2, 2, T, Cin)  four 2x2-pooling taps of one spatial tile,
    #                            channels-last, f32
    # scale_ref: (1, Cin)        folded BN scale = gamma / sqrt(var + eps)
    # shift_ref: (1, Cin)        folded BN shift = beta - mean * scale
    # w_ref:     (Cin, Cout_p)   1x1 conv weight (transposed, zero-padded), bf16
    # o_ref:     (T, Cout_p)     pooled output tile, f32
    s = scale_ref[...]
    b = shift_ref[...]

    def bn_relu(tap):                       # (T, Cin) f32 on the VPU
        return jnp.maximum(tap * s + b, 0.0)

    # 2x2 average pool = mean of the four taps (ReLU precedes the pool, as in
    # the reference; pool and the 1x1 conv commute since both are linear).
    pooled = 0.25 * (bn_relu(x_ref[0, 0]) + bn_relu(x_ref[0, 1])
                     + bn_relu(x_ref[1, 0]) + bn_relu(x_ref[1, 1]))

    # 1x1 conv on the pooled activations: bf16 operands, f32 accumulation.
    o_ref[...] = jnp.dot(pooled.astype(jnp.bfloat16), w_ref[...],
                         preferred_element_type=jnp.float32)


def _pick_spatial_tile(hwp, cin, budget_bytes=4 * 1024 * 1024):
    """Largest tile T of pooled spatial positions whose 4-tap f32 input block
    (4 * T * cin * 4 bytes) fits the budget.  T is a multiple of 8 dividing
    hwp, or hwp itself (full extent is always layout-legal)."""
    cands = [t for t in range(8, hwp, 8) if hwp % t == 0]
    cands.append(hwp)
    fitting = [t for t in cands if 4 * t * cin * 4 <= budget_bytes]
    if fitting:
        return max(fitting)
    return min(cands)


def transition_layer_pallas(x_nchw, gamma, beta, run_mean, run_var, conv_w, eps=1e-5):
    """x_nchw: (N, Cin, H, W) float32.  conv_w: (Cout, Cin, 1, 1).  Returns NCHW."""
    N, Cin, H, W = x_nchw.shape
    Cout = conv_w.shape[0]
    assert H % 2 == 0 and W % 2 == 0, "AvgPool2d(2,2) path requires even H and W"
    Hp, Wp = H // 2, W // 2
    HWp = Hp * Wp
    Cout_p = ((Cout + 127) // 128) * 128        # lane-dense output stores

    # --- parameter / layout glue (plain JAX) ---
    scale = (gamma / jnp.sqrt(run_var + eps)).astype(jnp.float32)       # (Cin,)
    shift = (beta - run_mean * scale).astype(jnp.float32)               # (Cin,)
    scale2 = scale.reshape(1, Cin)
    shift2 = shift.reshape(1, Cin)

    w = conv_w.reshape(Cout, Cin).T.astype(jnp.bfloat16)                # (Cin, Cout)
    if Cout_p != Cout:
        w = jnp.pad(w, ((0, 0), (0, Cout_p - Cout)))                    # (Cin, Cout_p)

    # NCHW -> (N, 2, 2, Hp*Wp, Cin): the 2x2 pooling taps become leading dims,
    # so the kernel needs no in-kernel sublane shuffles.  One XLA transpose,
    # same bytes as a plain NCHW->NHWC conversion.
    x6 = x_nchw.astype(jnp.float32).reshape(N, Cin, Hp, 2, Wp, 2)
    x6 = jnp.transpose(x6, (0, 3, 5, 2, 4, 1)).reshape(N, 2, 2, HWp, Cin)

    T = _pick_spatial_tile(HWp, Cin)
    S = HWp // T

    out = pl.pallas_call(
        transition_kernel,
        out_shape=jax.ShapeDtypeStruct((N, HWp, Cout_p), jnp.float32),
        grid_spec=pltpu.PrefetchScalarGridSpec(
            num_scalar_prefetch=0,
            grid=(N, S),
            in_specs=[
                pl.BlockSpec((pl.Squeezed(), 2, 2, T, Cin),
                             lambda n, s: (n, 0, 0, s, 0)),
                pl.BlockSpec((1, Cin), lambda n, s: (0, 0)),
                pl.BlockSpec((1, Cin), lambda n, s: (0, 0)),
                pl.BlockSpec((Cin, Cout_p), lambda n, s: (0, 0)),
            ],
            out_specs=pl.BlockSpec((pl.Squeezed(), T, Cout_p),
                                   lambda n, s: (n, s, 0)),
        ),
        compiler_params=pltpu.CompilerParams(
            dimension_semantics=("parallel", "parallel"),
            vmem_limit_bytes=32 * 1024 * 1024),
    )(x6, scale2, shift2, w)

    out = out[:, :, :Cout]                                   # drop lane padding
    # (N, Hp*Wp, Cout) -> NCHW (N, Cout, Hp, Wp)
    return jnp.transpose(out.reshape(N, Hp, Wp, Cout), (0, 3, 1, 2))


def transition_layer_ref(x, gamma, beta, run_mean, run_var, conv_w, eps=1e-5):
    """Pure-JAX f32 reference (eval-mode BN), NCHW."""
    bn = (x - run_mean[None, :, None, None]) / jnp.sqrt(run_var[None, :, None, None] + eps)
    bn = bn * gamma[None, :, None, None] + beta[None, :, None, None]
    y = jnp.maximum(bn, 0.0)
    z = jnp.einsum('nchw,oc->nohw', y, conv_w[:, :, 0, 0])
    N, Co, H, W = z.shape
    return z.reshape(N, Co, H // 2, 2, W // 2, 2).mean(axis=(3, 5))


if __name__ == "__main__":
    key = jax.random.PRNGKey(0)
    k_x, k_g, k_b, k_m, k_v, k_w = jax.random.split(key, 6)

    N, Cin, H, W = 2, 4, 16, 16
    Cout = 2

    x = jax.random.normal(k_x, (N, Cin, H, W), dtype=jnp.float32)
    gamma = jax.random.normal(k_g, (Cin,), dtype=jnp.float32) * 0.1 + 1.0
    beta = jax.random.normal(k_b, (Cin,), dtype=jnp.float32) * 0.1
    run_mean = jax.random.normal(k_m, (Cin,), dtype=jnp.float32) * 0.1
    run_var = jnp.abs(jax.random.normal(k_v, (Cin,), dtype=jnp.float32)) * 0.5 + 0.5
    conv_w = jax.random.normal(k_w, (Cout, Cin, 1, 1), dtype=jnp.float32) * 0.5

    out = transition_layer_pallas(x, gamma, beta, run_mean, run_var, conv_w)
    out = jax.block_until_ready(out)

    ref = transition_layer_ref(x, gamma, beta, run_mean, run_var, conv_w)
    assert out.shape == (N, Cout, H // 2, W // 2), out.shape
    # Tolerance reflects bf16 MXU operands (f32 accumulation) vs the f32 reference.
    np.testing.assert_allclose(np.asarray(out), np.asarray(ref), rtol=2e-2, atol=2e-2)

    print("KERNEL_OK")
</pallas_src>

<mosaic_0001>
module attributes {stable_mosaic.version = 11 : i64} {
  func.func @transition_kernel(%arg0: i32, %arg1: i32, %arg2: memref<1x2x2x64x4xf32, #tpu.memory_space<vmem>>, %arg3: memref<1x4xf32, #tpu.memory_space<vmem>>, %arg4: memref<1x4xf32, #tpu.memory_space<vmem>>, %arg5: memref<4x128xbf16, #tpu.memory_space<vmem>>, %arg6: memref<1x64x128xf32, #tpu.memory_space<vmem>>) attributes {dimension_semantics = [#tpu.dimension_semantics<parallel>, #tpu.dimension_semantics<parallel>], iteration_bounds = array<i64: 2, 1>, scalar_prefetch = 0 : i64, scratch_operands = 0 : i64, tpu.core_type = #tpu.core_type<tc>, window_params = [{transform_indices = @transform_0, window_bounds = array<i64: 1, 2, 2, 64, 4>}, {pipeline_mode = #tpu.pipeline_mode<synchronous>, transform_indices = @transform_1, window_bounds = array<i64: 1, 4>}, {pipeline_mode = #tpu.pipeline_mode<synchronous>, transform_indices = @transform_2, window_bounds = array<i64: 1, 4>}, {pipeline_mode = #tpu.pipeline_mode<synchronous>, transform_indices = @transform_3, window_bounds = array<i64: 4, 128>}, {transform_indices = @transform_4, window_bounds = array<i64: 1, 64, 128>}]} {
    %c0 = arith.constant 0 : index
    %c0_0 = arith.constant 0 : index
    %0 = vector.load %arg3[%c0, %c0_0] : memref<1x4xf32, #tpu.memory_space<vmem>>, vector<1x4xf32>
    %c0_1 = arith.constant 0 : index
    %c0_2 = arith.constant 0 : index
    %1 = vector.load %arg4[%c0_1, %c0_2] : memref<1x4xf32, #tpu.memory_space<vmem>>, vector<1x4xf32>
    %c0_3 = arith.constant 0 : index
    %c0_4 = arith.constant 0 : index
    %c0_5 = arith.constant 0 : index
    %c0_6 = arith.constant 0 : index
    %c0_7 = arith.constant 0 : index
    %2 = vector.load %arg2[%c0_3, %c0_4, %c0_5, %c0_6, %c0_7] : memref<1x2x2x64x4xf32, #tpu.memory_space<vmem>>, vector<1x1x1x64x4xf32>
    %3 = vector.shape_cast %2 : vector<1x1x1x64x4xf32> to vector<64x4xf32>
    %4 = vector.broadcast %0 : vector<1x4xf32> to vector<64x4xf32>
    %5 = arith.mulf %3, %4 : vector<64x4xf32>
    %6 = vector.broadcast %1 : vector<1x4xf32> to vector<64x4xf32>
    %7 = arith.addf %5, %6 : vector<64x4xf32>
    %cst = arith.constant 0.000000e+00 : f32
    %8 = vector.broadcast %cst : f32 to vector<64x4xf32>
    %9 = arith.maximumf %7, %8 : vector<64x4xf32>
    %c0_8 = arith.constant 0 : index
    %c0_9 = arith.constant 0 : index
    %c1 = arith.constant 1 : index
    %c0_10 = arith.constant 0 : index
    %c0_11 = arith.constant 0 : index
    %10 = vector.load %arg2[%c0_8, %c0_9, %c1, %c0_10, %c0_11] : memref<1x2x2x64x4xf32, #tpu.memory_space<vmem>>, vector<1x1x1x64x4xf32>
    %11 = vector.shape_cast %10 : vector<1x1x1x64x4xf32> to vector<64x4xf32>
    %12 = vector.broadcast %0 : vector<1x4xf32> to vector<64x4xf32>
    %13 = arith.mulf %11, %12 : vector<64x4xf32>
    %14 = vector.broadcast %1 : vector<1x4xf32> to vector<64x4xf32>
    %15 = arith.addf %13, %14 : vector<64x4xf32>
    %cst_12 = arith.constant 0.000000e+00 : f32
    %16 = vector.broadcast %cst_12 : f32 to vector<64x4xf32>
    %17 = arith.maximumf %15, %16 : vector<64x4xf32>
    %18 = arith.addf %9, %17 : vector<64x4xf32>
    %c0_13 = arith.constant 0 : index
    %c1_14 = arith.constant 1 : index
    %c0_15 = arith.constant 0 : index
    %c0_16 = arith.constant 0 : index
    %c0_17 = arith.constant 0 : index
    %19 = vector.load %arg2[%c0_13, %c1_14, %c0_15, %c0_16, %c0_17] : memref<1x2x2x64x4xf32, #tpu.memory_space<vmem>>, vector<1x1x1x64x4xf32>
    %20 = vector.shape_cast %19 : vector<1x1x1x64x4xf32> to vector<64x4xf32>
    %21 = vector.broadcast %0 : vector<1x4xf32> to vector<64x4xf32>
    %22 = arith.mulf %20, %21 : vector<64x4xf32>
    %23 = vector.broadcast %1 : vector<1x4xf32> to vector<64x4xf32>
    %24 = arith.addf %22, %23 : vector<64x4xf32>
    %cst_18 = arith.constant 0.000000e+00 : f32
    %25 = vector.broadcast %cst_18 : f32 to vector<64x4xf32>
    %26 = arith.maximumf %24, %25 : vector<64x4xf32>
    %27 = arith.addf %18, %26 : vector<64x4xf32>
    %c0_19 = arith.constant 0 : index
    %c1_20 = arith.constant 1 : index
    %c1_21 = arith.constant 1 : index
    %c0_22 = arith.constant 0 : index
    %c0_23 = arith.constant 0 : index
    %28 = vector.load %arg2[%c0_19, %c1_20, %c1_21, %c0_22, %c0_23] : memref<1x2x2x64x4xf32, #tpu.memory_space<vmem>>, vector<1x1x1x64x4xf32>
    %29 = vector.shape_cast %28 : vector<1x1x1x64x4xf32> to vector<64x4xf32>
    %30 = vector.broadcast %0 : vector<1x4xf32> to vector<64x4xf32>
    %31 = arith.mulf %29, %30 : vector<64x4xf32>
    %32 = vector.broadcast %1 : vector<1x4xf32> to vector<64x4xf32>
    %33 = arith.addf %31, %32 : vector<64x4xf32>
    %cst_24 = arith.constant 0.000000e+00 : f32
    %34 = vector.broadcast %cst_24 : f32 to vector<64x4xf32>
    %35 = arith.maximumf %33, %34 : vector<64x4xf32>
    %36 = arith.addf %27, %35 : vector<64x4xf32>
    %cst_25 = arith.constant 2.500000e-01 : f32
    %37 = vector.broadcast %cst_25 : f32 to vector<64x4xf32>
    %38 = arith.mulf %37, %36 : vector<64x4xf32>
    %39 = arith.truncf %38 : vector<64x4xf32> to vector<64x4xbf16>
    %c0_26 = arith.constant 0 : index
    %c0_27 = arith.constant 0 : index
    %40 = vector.load %arg5[%c0_26, %c0_27] : memref<4x128xbf16, #tpu.memory_space<vmem>>, vector<4x128xbf16>
    %cst_28 = arith.constant dense<0.000000e+00> : vector<64x128xf32>
    %41 = tpu.matmul %39, %40, %cst_28 {dimension_numbers = #tpu.dot_dimension_numbers<[1], [0], [0], [1], [0, 0, 1, 1], [], []>} : vector<64x4xbf16>, vector<4x128xbf16>, vector<64x128xf32> -> vector<64x128xf32>
    %c0_29 = arith.constant 0 : index
    %c0_30 = arith.constant 0 : index
    %c0_31 = arith.constant 0 : index
    %42 = vector.load %arg6[%c0_29, %c0_30, %c0_31] : memref<1x64x128xf32, #tpu.memory_space<vmem>>, vector<1x64x128xf32>
    %43 = vector.shape_cast %42 : vector<1x64x128xf32> to vector<64x128xf32>
    %44 = vector.shape_cast %41 : vector<64x128xf32> to vector<1x64x128xf32>
    tpu.vector_store %arg6[%c0_29, %c0_30, %c0_31], %44 {strides = array<i32>} : memref<1x64x128xf32, #tpu.memory_space<vmem>>, vector<1x64x128xf32>,
    return
  }
  func.func @transform_0(%arg0: i32, %arg1: i32) -> (i32, i32, i32, i32, i32) {
    %c0_i32 = arith.constant 0 : i32
    %c0_i32_0 = arith.constant 0 : i32
    %c0_i32_1 = arith.constant 0 : i32
    %c0_i32_2 = arith.constant 0 : i32
    return %arg0, %c0_i32, %c0_i32_0, %arg1, %c0_i32_1 : i32, i32, i32, i32, i32
  }
  func.func @transform_1(%arg0: i32, %arg1: i32) -> (i32, i32) {
    %c0_i32 = arith.constant 0 : i32
    %c0_i32_0 = arith.constant 0 : i32
    %c0_i32_1 = arith.constant 0 : i32
    return %c0_i32, %c0_i32_0 : i32, i32
  }
  func.func @transform_2(%arg0: i32, %arg1: i32) -> (i32, i32) {
    %c0_i32 = arith.constant 0 : i32
    %c0_i32_0 = arith.constant 0 : i32
    %c0_i32_1 = arith.constant 0 : i32
    return %c0_i32, %c0_i32_0 : i32, i32
  }
  func.func @transform_3(%arg0: i32, %arg1: i32) -> (i32, i32) {
    %c0_i32 = arith.constant 0 : i32
    %c0_i32_0 = arith.constant 0 : i32
    %c0_i32_1 = arith.constant 0 : i32
    return %c0_i32, %c0_i32_0 : i32, i32
  }
  func.func @transform_4(%arg0: i32, %arg1: i32) -> (i32, i32, i32) {
    %c0_i32 = arith.constant 0 : i32
    %c0_i32_0 = arith.constant 0 : i32
    return %arg0, %arg1, %c0_i32 : i32, i32, i32
  }
}

</mosaic_0001>

<bundles_post_ra>
// kernel: tpu_custom_call.1
= control target key start
LH: loop header
LB: loop body
LE: loop exit
PB: predicated region body
PF: predicated region fallthrough
CT: control target
= control target key end

     0   :  { %9 = vsyncpa [#allocation3], 0  ;;  %s1051_s0 = inlined_call_operand.vmem [shape: f32[2,2,2,64,4], index: 0, kind: input, shape index: {}]   ;;  %s1052_s1 = inlined_call_operand.vmem [shape: f32[1,4], index: 1, kind: input, shape index: {}]   ;;  %s1053_s2 = inlined_call_operand.vmem [shape: f32[1,4], index: 2, kind: input, shape index: {}]   ;;  %s1054_s3 = inlined_call_operand.vmem [shape: bf16[4,128], index: 3, kind: input, shape index: {}]   ;;  %s1055_s4 = inlined_call_operand.hbm [shape: f32[2,64,128], index: 4, kind: output, shape index: {}]  }
   0x1   :  { %11 = vsyncpa [#allocation3 + $0x1], 0  ;;  %s822_s15 = smov 0   ;;  %s824_s16 = smov 0  }
   0x2   :  { %s826_s17 = smov 0   ;;  %s828_s18 = smov 0  }
   0x3   :  { %s830_s19 = smov 0   ;;  %s832_s20 = smov 0  }
   0x4 LB: > { %s595_s21 = sadd.s32 4294967295, %s792_s20   ;;  %s596_s22 = sadd.s32 4294967294, %s792_s20   ;;  %s792_s20 = sphi %s832_s20, %s17_s20   ;;  %s788_s19 = sphi %s830_s19, %s1062_s19   ;;  %s784_s18 = sphi %s828_s18, %s1061_s18   ;;  %s780_s17 = sphi %s826_s17, %s1060_s17   ;;  %s776_s16 = sphi %s824_s16, %s1059_s16   ;;  %s772_s15 = sphi %s822_s15, %s1058_s15  }
   0x5   : > { %s29_s23 = sadd.s32 1, %s788_s19  ;;  %s129_s24 = sadd.s32 1, %s780_s17 }
   0x6   : > { %p31_p0 = scmp.ge.s32.totalorder %s29_s23, 2  ;;  %p139_p1 = scmp.ne.s32.totalorder %s780_s17, %s776_s16 }
   0x7   : > { %p140_p2 = scmp.eq.s32.totalorder %s595_s21, 1  ;;  %p145_p3 = scmp.ne.s32.totalorder %s776_s16, %s772_s15 }
   0x8   : > { %s1064_s23 = smov (%p31_p0, %s29_s23), 0  ;;  %p146_p5 = scmp.eq.s32.totalorder %s596_s22, 1 }
   0x9   : > { %p862_p4 = por %p140_p2, %p139_p1  ;;  %s124_s26 = ssub.s32 %s788_s19, %s1064_s23 }
   0xa   : > { %p599_p6 = scmp.ge.s32.totalorder %s792_s20, 1  ;;  %p127_p7 = scmp.eq.s32.totalorder %s124_s26, 0 }
   0xb   : > { %p869_p8 = por %p146_p5, %p145_p3  ;;  %p186_p9 = scmp.lt.s32.totalorder %s792_s20, 3 }
   0xc   : > { %s875_s28 = scalar_select %p127_p7, %s780_s17, %s129_s24  }
   0xd   : > { %p187_p10 = pnand %p599_p6, %p186_p9 }
   0xe   : > { %p217_p11 = scmp.lt.s32.totalorder (!%p187_p10), %s784_s18, 1  ;;  %s213_s14 = sand.u32 (!%p187_p10), 1, %s776_s16  }
   0xf   : > { %190 = sbr.rel (%p187_p10) target bundleno = 279 (0x117), region = 36  ;;  %s600_s21 = sshll.u32 (!%p187_p10), %s213_s14, 6 }
  0x10   : > { %s215_s22 = scalar_lea.vmem (!%p187_p10), [#allocation2], %s600_s21  ;;  %s639_s26 = sshll.u32 (!%p187_p10), %s784_s18, 10 }
  0x11   : > { %s516_s24 = sshll.u32 (!%p187_p10), %s215_s22, 4  ;;  %s999_s24 = int_to_ptr.vmem [resolvable:$true] %s516_s24 }
  0x12   : > { %s716_s7 = scalar_lea.vmem (!%p187_p10), %s999_s24, 1024 }
  0x13   : > { %p717_p12 = scmp.ne.s32.totalorder (!%p187_p10), %s999_s24, %s716_s7 }
  0x14   : > { %v409_v0 = vld [vmem:[%s1054_s3] sm:$0x3]  ;;  %vm423_vm0 = vcmask 1041408   ;;  %s218_s5 = scalar_select %p217_p11, %s784_s18, 1  ;;  %vm410_vm1 = vcmask 31744  }
  0x15   : > { %657 = vmatprep.subr.msk.bf16.mxu0 %vm423_vm0, %v409_v0  ;;  %658 = vmatprep.subr.msk.bf16.mxu1 %vm423_vm0, %v409_v0  ;;  %v425_v1 = vsel %vm423_vm0, %v409_v0, 0  ;;  %v885_v2 = vld [vmem:[%s1052_s1] ss:$0 sm:$0xff]  ;;  %p718_p13 = pnand %p717_p12, %p862_p4  ;;  %s794_s18 = smov [#allocation2]  }
  0x16   : > { %646 = vmatpush3.bf16.msra.mxu0 %v425_v1  ;;  %656 = vmatpush3.bf16.msra.mxu1 %v425_v1  ;;  %s638_s6 = sshll.u32 %s218_s5, 8  ;;  %v895_v3 = vld [vmem:[%s1053_s2] ss:$0 sm:$0xff]  ;;  %s1004_s5 = scalar_lea.hbm %s1055_s4, %s639_s26 }
  0x17   : > { %s890_s11 = scalar_lea.vmem %s1051_s0, %s638_s6  ;;  %s1006_s6 = scalar_lea.sflag [#allocation3], %s213_s14 }
  0x18   : > { %v230_v4 = vld [vmem:[%s890_s11] sm:$0xff]  ;;  %v231_v5 = vld [vmem:[%s890_s11 + $0x8] sm:$0xff]  ;;  %p719_p0 = pneg %p718_p13  ;;  %s720_s8 = sshll.u32 %s794_s18, 4  ;;  %s721_s8 = int_to_ptr.vmem [resolvable:$false] %s720_s8 }
  0x19   : > { %v605_v6 = vld [vmem:[%s890_s11 + $0x40] sm:$0xff]  ;;  %v244_v7 = vmul.f32 %v885_v2, %v230_v4  ;;  %v245_v8 = vmul.f32 %v885_v2, %v231_v5  ;;  %v606_v9 = vld [vmem:[%s890_s11 + $0x48] sm:$0xff]  ;;  %v232_v4 = vld [vmem:[%s890_s11 + $0x10] sm:$0xff]  ;;  %s722_s9 = scalar_lea.vmem %s721_s8, 2048  ;;  %p723_p1 = scmp.lt.s32.totalorder %s999_s24, %s721_s8 }
  0x1a   : > { %v283_v10 = vmul.f32 %v605_v6, %v885_v2  ;;  %v613_v11 = vld [vmem:[%s890_s11 + $0x80] sm:$0xff]  ;;  %v614_v12 = vld [vmem:[%s890_s11 + $0x88] sm:$0xff]  ;;  %v284_v13 = vmul.f32 %v606_v9, %v885_v2  ;;  %v233_v5 = vld [vmem:[%s890_s11 + $0x18] sm:$0xff]  ;;  %p724_p2 = scmp.lt.s32.totalorder %s722_s9, %s716_s7 }
  0x1b   : > { %v324_v14 = vmul.f32 %v613_v11, %v885_v2  ;;  %v325_v15 = vmul.f32 %v614_v12, %v885_v2  ;;  %v621_v16 = vld [vmem:[%s890_s11 + $0xc0] sm:$0xff]  ;;  %v622_v17 = vld [vmem:[%s890_s11 + $0xc8] sm:$0xff]  ;;  %v258_v18 = vadd.f32 %v895_v3, %v244_v7  ;;  %v259_v19 = vadd.f32 %v895_v3, %v245_v8 }
  0x1c   : > { %v291_v20 = vadd.f32 %v895_v3, %v283_v10  ;;  %v365_v21 = vmul.f32 %v621_v16, %v885_v2  ;;  %v292_v22 = vadd.f32 %v895_v3, %v284_v13  ;;  %v366_v25 = vmul.f32 %v622_v17, %v885_v2  ;;  %v234_v26 = vld [vmem:[%s890_s11 + $0x20] sm:$0xff]  ;;  %v235_v27 = vld [vmem:[%s890_s11 + $0x28] sm:$0xff]  ;;  %v607_v10 = vld [vmem:[%s890_s11 + $0x50] sm:$0xff]  ;;  %p725_p3 = por %p724_p2, %p723_p1 }
  0x1d   : > { %v332_v23 = vadd.f32 %v895_v3, %v324_v14  ;;  %v333_v24 = vadd.f32 %v895_v3, %v325_v15  ;;  %v266_v28 = vmax.f32 %v258_v18, 0.0  ;;  %v267_v29 = vmax.f32 %v259_v19, 0.0  ;;  %v609_v32 = vld [vmem:[%s890_s11 + $0x60] sm:$0xff]  ;;  %v610_v33 = vld [vmem:[%s890_s11 + $0x68] sm:$0xff]  ;;  %v608_v19 = vld [vmem:[%s890_s11 + $0x58] sm:$0xff] }
  0x1e   : > { %v299_v30 = vmax.f32 %v291_v20, 0.0  ;;  %v373_v31 = vadd.f32 %v895_v3, %v365_v21  ;;  %v300_v34 = vmax.f32 %v292_v22, 0.0  ;;  %v374_v37 = vadd.f32 %v895_v3, %v366_v25  ;;  %v617_v38 = vld [vmem:[%s890_s11 + $0xa0] sm:$0xff]  ;;  %v618_v43 = vld [vmem:[%s890_s11 + $0xa8] sm:$0xff]  ;;  %v615_v20 = vld [vmem:[%s890_s11 + $0x90] sm:$0xff]  ;;  %p726_p5 = pnand %p725_p3, %p719_p0 }
  0x1f   : > { %v340_v35 = vmax.f32 %v332_v23, 0.0  ;;  %v341_v36 = vmax.f32 %v333_v24, 0.0  ;;  %v248_v41 = vmul.f32 %v885_v2, %v234_v26  ;;  %v249_v42 = vmul.f32 %v885_v2, %v235_v27  ;;  %v625_v56 = vld [vmem:[%s890_s11 + $0xe0] sm:$0xff]  ;;  %v626_v57 = vld [vmem:[%s890_s11 + $0xe8] sm:$0xff]  ;;  %v616_v21 = vld [vmem:[%s890_s11 + $0x98] sm:$0xff] }
  0x20   : > { %v307_v39 = vadd.f32 %v299_v30, %v266_v28  ;;  %v381_v40 = vmax.f32 %v373_v31, 0.0  ;;  %v308_v44 = vadd.f32 %v300_v34, %v267_v29  ;;  %v382_v45 = vmax.f32 %v374_v37, 0.0  ;;  %v623_v34 = vld [vmem:[%s890_s11 + $0xd0] sm:$0xff] }
  0x21   : > { %v287_v46 = vmul.f32 %v609_v32, %v885_v2  ;;  %v288_v47 = vmul.f32 %v610_v33, %v885_v2  ;;  %v262_v49 = vadd.f32 %v895_v3, %v248_v41  ;;  %v263_v50 = vadd.f32 %v895_v3, %v249_v42 }
  0x22   : > { %v348_v48 = vadd.f32 %v340_v35, %v307_v39  ;;  %v328_v51 = vmul.f32 %v617_v38, %v885_v2  ;;  %v349_v52 = vadd.f32 %v341_v36, %v308_v44  ;;  %v329_v55 = vmul.f32 %v618_v43, %v885_v2  ;;  %v624_v35 = vld [vmem:[%s890_s11 + $0xd8] sm:$0xff]  ;;  %v236_v44 = vld [vmem:[%s890_s11 + $0x30] sm:$0xff] }
  0x23   : > { %v295_v53 = vadd.f32 %v895_v3, %v287_v46  ;;  %v296_v54 = vadd.f32 %v895_v3, %v288_v47  ;;  %v270_v59 = vmax.f32 %v262_v49, 0.0  ;;  %v271_v60 = vmax.f32 %v263_v50, 0.0  ;;  %v237_v49 = vld [vmem:[%s890_s11 + $0x38] sm:$0xff]  ;;  %v611_v50 = vld [vmem:[%s890_s11 + $0x70] sm:$0xff] }
  0x24   : > { %v389_v58 = vadd.f32 %v381_v40, %v348_v48  ;;  %v336_v61 = vadd.f32 %v895_v3, %v328_v51  ;;  %v390_v62 = vadd.f32 %v382_v45, %v349_v52  ;;  %v337_v1 = vadd.f32 %v895_v3, %v329_v55  ;;  %v612_v55 = vld [vmem:[%s890_s11 + $0x78] sm:$0xff] }
  0x25   : > { %v303_v63 = vmax.f32 %v295_v53, 0.0  ;;  %v304_v0 = vmax.f32 %v296_v54, 0.0  ;;  %v369_v8 = vmul.f32 %v625_v56, %v885_v2  ;;  %v370_v9 = vmul.f32 %v626_v57, %v885_v2 }
  0x26   : > { %v397_v6 = vmul.f32 0.25, %v389_v58  ;;  %v344_v7 = vmax.f32 %v336_v61, 0.0  ;;  %v398_v11 = vmul.f32 0.25, %v390_v62  ;;  %v345_v14 = vmax.f32 %v337_v1, 0.0  ;;  %v620_v1 = vld [vmem:[%s890_s11 + $0xb8] sm:$0xff] }
  0x27   : > { %v311_v12 = vadd.f32 %v303_v63, %v270_v59  ;;  %v312_v13 = vadd.f32 %v304_v0, %v271_v60  ;;  %v377_v15 = vadd.f32 %v895_v3, %v369_v8  ;;  %v378_v16 = vadd.f32 %v895_v3, %v370_v9  ;;  %v619_v60 = vld [vmem:[%s890_s11 + $0xb0] sm:$0xff] }
  0x28   : > { %v246_v17 = vmul.f32 %v885_v2, %v232_v4  ;;  %v247_v18 = vmul.f32 %v885_v2, %v233_v5  ;;  %v405_v22 = vpack.c.bf16 %v398_v11, %v397_v6  ;;  %v285_v25 = vmul.f32 %v607_v10, %v885_v2 }
  0x29   : > { %v352_v23 = vadd.f32 %v344_v7, %v311_v12  ;;  %v353_v24 = vadd.f32 %v345_v14, %v312_v13  ;;  %v385_v26 = vmax.f32 %v377_v15, 0.0  ;;  %v386_v27 = vmax.f32 %v378_v16, 0.0  ;;  %v627_v12 = vld [vmem:[%s890_s11 + $0xf0] sm:$0xff] }
  0x2a   : > { %v260_v28 = vadd.f32 %v895_v3, %v246_v17  ;;  %v261_v29 = vadd.f32 %v895_v3, %v247_v18  ;;  %647 = vmatprep.mubr.msk.bf16.mxu0 %vm410_vm1, %v405_v22  ;;  %v286_v30 = vmul.f32 %v608_v19, %v885_v2  ;;  %v293_v31 = vadd.f32 %v895_v3, %v285_v25  ;;  %v628_v17 = vld [vmem:[%s890_s11 + $0xf8] sm:$0xff] }
  0x2b   : > { %v326_v32 = vmul.f32 %v615_v20, %v885_v2  ;;  %v327_v33 = vmul.f32 %v616_v21, %v885_v2  ;;  %v393_v36 = vadd.f32 %v385_v26, %v352_v23  ;;  %v394_v37 = vadd.f32 %v386_v27, %v353_v24 }
  0x2c   : > { %v268_v38 = vmax.f32 %v260_v28, 0.0  ;;  %v269_v39 = vmax.f32 %v261_v29, 0.0  ;;  %v294_v40 = vadd.f32 %v895_v3, %v286_v30  ;;  %v301_v41 = vmax.f32 %v293_v31, 0.0 }
  0x2d   : > { %v334_v42 = vadd.f32 %v895_v3, %v326_v32  ;;  %v335_v43 = vadd.f32 %v895_v3, %v327_v33  ;;  %v401_v45 = vmul.f32 0.25, %v393_v36  ;;  %v402_v46 = vmul.f32 0.25, %v394_v37 }
  0x2e   : > { %v367_v47 = vmul.f32 %v623_v34, %v885_v2  ;;  %v368_v48 = vmul.f32 %v624_v35, %v885_v2  ;;  %v302_v51 = vmax.f32 %v294_v40, 0.0  ;;  %v309_v52 = vadd.f32 %v301_v41, %v268_v38 }
  0x2f   : > { %v342_v53 = vmax.f32 %v334_v42, 0.0  ;;  %v343_v54 = vmax.f32 %v335_v43, 0.0  ;;  %v407_v56 = vpack.c.bf16 %v402_v46, %v401_v45  ;;  %v250_v59 = vmul.f32 %v885_v2, %v236_v44 }
  0x30   : > { %v375_v57 = vadd.f32 %v895_v3, %v367_v47  ;;  %v376_v58 = vadd.f32 %v895_v3, %v368_v48  ;;  %v310_v61 = vadd.f32 %v302_v51, %v269_v39  ;;  %v251_v63 = vmul.f32 %v885_v2, %v237_v49 }
  0x31   : > { %v350_v62 = vadd.f32 %v342_v53, %v309_v52  ;;  %v289_v0 = vmul.f32 %v611_v50, %v885_v2  ;;  %651 = vmatprep.mubr.msk.bf16.mxu1 %vm410_vm1, %v407_v56  ;;  %v264_v6 = vadd.f32 %v895_v3, %v250_v59  ;;  %v290_v7 = vmul.f32 %v612_v55, %v885_v2 }
  0x32   : > { %v383_v4 = vmax.f32 %v375_v57, 0.0  ;;  %v384_v5 = vmax.f32 %v376_v58, 0.0  ;;  %v351_v8 = vadd.f32 %v343_v54, %v310_v61  ;;  %v265_v9 = vadd.f32 %v895_v3, %v251_v63 }
  0x33   : > { %v297_v10 = vadd.f32 %v895_v3, %v289_v0  ;;  %v330_v11 = vmul.f32 %v619_v60, %v885_v2  ;;  %v272_v14 = vmax.f32 %v264_v6, 0.0  ;;  %v298_v15 = vadd.f32 %v895_v3, %v290_v7 }
  0x34   : > { %v391_v13 = vadd.f32 %v383_v4, %v350_v62  ;;  %v331_v16 = vmul.f32 %v620_v1, %v885_v2  ;;  %v392_v18 = vadd.f32 %v384_v5, %v351_v8  ;;  %v273_v19 = vmax.f32 %v265_v9, 0.0 }
  0x35   : > { %v305_v20 = vmax.f32 %v297_v10, 0.0  ;;  %v338_v21 = vadd.f32 %v895_v3, %v330_v11  ;;  %v306_v23 = vmax.f32 %v298_v15, 0.0  ;;  %v371_v25 = vmul.f32 %v627_v12, %v885_v2 }
  0x36   : > { %v399_v22 = vmul.f32 0.25, %v391_v13  ;;  %v339_v24 = vadd.f32 %v895_v3, %v331_v16  ;;  %v400_v26 = vmul.f32 0.25, %v392_v18  ;;  %v372_v29 = vmul.f32 %v628_v17, %v885_v2 }
  0x37   : > { %v313_v27 = vadd.f32 %v305_v20, %v272_v14  ;;  %v346_v28 = vmax.f32 %v338_v21, 0.0  ;;  %v314_v30 = vadd.f32 %v306_v23, %v273_v19  ;;  %v379_v32 = vadd.f32 %v895_v3, %v371_v25 }
  0x38   : > { %v347_v31 = vmax.f32 %v339_v24, 0.0  ;;  %v406_v33 = vpack.c.bf16 %v400_v26, %v399_v22  ;;  %v380_v35 = vadd.f32 %v895_v3, %v372_v29 }
  0x39   : > { %v354_v34 = vadd.f32 %v346_v28, %v313_v27  ;;  %v387_v37 = vmax.f32 %v379_v32, 0.0 }
  0x3a   : > { %v355_v36 = vadd.f32 %v347_v31, %v314_v30  ;;  %648 = vmatmul.mubr.msk.bf16.vlgmr.msra.gmra.mxu0 %vm410_vm1, %v406_v33  ;;  %v388_v38 = vmax.f32 %v380_v35, 0.0 }
  0x3b   : > { %v395_v39 = vadd.f32 %v387_v37, %v354_v34 }
  0x3c   : > { %v396_v40 = vadd.f32 %v388_v38, %v355_v36 }
  0x3d   : > { %v403_v41 = vmul.f32 0.25, %v395_v39 }
  0x3e   : > { %v404_v42 = vmul.f32 0.25, %v396_v40 }
  0x40   : > { %v408_v43 = vpack.c.bf16 %v404_v42, %v403_v41 }
  0x42   : > { %652 = vmatmul.mubr.msk.bf16.vlgmr.msra.gmra.mxu1 %vm410_vm1, %v408_v43 }
  0xfa   : > { %v649_v2 = vpop.f32.mrf.mxu0 }
  0xfb   : > { %494 = vst [vmem:[%s215_s22 + $0x10] sm:$0xff] %v649_v2 }
  0xfc   : > { %v461_v44 = vpop.f32.mrf.mxu0 }
  0xfd   : > { %492 = vst [vmem:[%s215_s22] sm:$0xff] %v461_v44 }
  0xfe   : > { %v650_v3 = vpop.f32.mrf.mxu0 }
  0xff   : > { %495 = vst [vmem:[%s215_s22 + $0x18] sm:$0xff] %v650_v3 }
 0x100   : > { %v464_v45 = vpop.f32.mrf.mxu0 }
 0x101   : > { %493 = vst [vmem:[%s215_s22 + $0x8] sm:$0xff] %v464_v45 }
 0x102   : > { %v653_v46 = vpop.f32.mrf.mxu1 }
 0x103   : > { %498 = vst [vmem:[%s215_s22 + $0x30] sm:$0xff] %v653_v46 }
 0x104   : > { %v477_v47 = vpop.f32.mrf.mxu1 }
 0x105   : > { %496 = vst [vmem:[%s215_s22 + $0x20] sm:$0xff] %v477_v47 }
 0x106   : > { %v654_v48 = vpop.f32.mrf.mxu1 }
 0x107   : > { %499 = vst [vmem:[%s215_s22 + $0x38] sm:$0xff] %v654_v48 }
 0x108   : > { %v480_v49 = vpop.f32.mrf.mxu1 }
 0x109   : > { %497 = vst [vmem:[%s215_s22 + $0x28] sm:$0xff] %v480_v49 }
 0x10a   : > { %729 = shalt.err (!%p726_p5)
}
 0x10b   : > { %s730_s10 = scalar_lea.hbm %s1004_s5, 1024  ;;  %s734_s13 = scalar_lea.hbm %s1055_s4, 2048 }
 0x10c   : > { %p731_p6 = scmp.ne.s32.totalorder %s1004_s5, %s730_s10  ;;  %p735_p10 = scmp.lt.s32.totalorder %s1004_s5, %s1055_s4 }
 0x10d   : > { %p736_p11 = scmp.lt.s32.totalorder %s734_s13, %s730_s10 }
 0x10e   : > { %p732_p7 = pnand %p731_p6, %p862_p4 }
 0x10f   : > { %p737_p12 = por %p736_p11, %p735_p10 }
 0x110   : > { %p733_p9 = pneg %p732_p7 }
 0x112   : > { %p738_p13 = pnand %p737_p12, %p733_p9 }
 0x114   : > { %741 = shalt.err (!%p738_p13)
}
 0x115   : > { %s795_s22 = smov 128   ;;  %s796_s26 = smov 8  }
 0x116   : > { %659 = dma.vmem_to_hbm [thread:$0]  (%p862_p4), %s999_s24, 1024, %s1004_s5, %s1006_s6, %s795_s22, %s795_s22, %s796_s26  }
 0x117 PF: > { %p665_p0 = scmp.ge.s32.totalorder %s792_s20, 2  ;;  %s531_s29 = sand.u32 1, %s772_s15  }
 0x118   : > { %s532_s30 = scalar_lea.sflag [#allocation3], %s531_s29 }
 0x119   : > { %p662_p1 = pnand %p665_p0, %p869_p8 }
 0x11b   : > { %p663_p2 = pneg %p662_p1 }
 0x11d   : > { %767 = dma.done.wait (%p663_p2), %s532_s30, 1024  }
 0x11e   : > { %769 = vsyncadd (%p663_p2), %s532_s30, 4294966272  ;;  %s17_s20 = sadd.s32 1, %s792_s20   ;;  %s1058_s15 = smov %s776_s16 }
 0x11f   : > { %p14_p3 = scmp.ge.s32.totalorder %s17_s20, 4   ;;  %s1059_s16 = smov %s780_s17 }
 0x120   : > { %s1060_s17 = smov %s875_s28  ;;  %s1061_s18 = smov %s788_s19 }
 0x121   : > { %s1062_s19 = smov %s1064_s23  ;;  %16 = sbr.rel (!%p14_p3) target bundleno = 4 (0x4), region = 74 }
 0x126   :  { %537 = vsyncpa [#allocation3], 1 }
 0x127   :  { %539 = vsyncpa [#allocation3 + $0x1], 1 }

</bundles_post_ra>
